<compile_context>
chip_gen: v7x
topology: tpu7x:2x2x1
jax: 0.10.0
libtpu: 0.0.40
codegen_flags: <defaults>
</compile_context>

<pallas_src>
import functools
import math

import jax
import jax.numpy as jnp
from jax.experimental import pallas as pl
from jax.experimental.pallas import tpu as pltpu


def _round_up(x, m):
    return ((x + m - 1) // m) * m


def actor_kernel(obs_ref, w0_ref, b0_ref, w1_ref, b1_ref, wo_ref, bo_ref,
                 logstd_ref, eps_ref, out_ref, *, action_dim):
    # fc0 -> tanh -> fc1 -> tanh -> out, f32 MXU accumulation
    x = jnp.tanh(jnp.dot(obs_ref[...], w0_ref[...],
                         preferred_element_type=jnp.float32) + b0_ref[...])
    x = jnp.tanh(jnp.dot(x, w1_ref[...],
                         preferred_element_type=jnp.float32) + b1_ref[...])
    mean = jnp.dot(x, wo_ref[...],
                   preferred_element_type=jnp.float32) + bo_ref[...]   # (tile_b, a_out)

    logstd = logstd_ref[...]                 # (1, a_out), zeros in padded lanes
    std = jnp.exp(logstd)                    # 1.0 in padded lanes
    eps = eps_ref[...]                       # (tile_b, a_out), zeros in padding

    # reparameterized sample; padded columns stay exactly 0 (mean pad cols are 0)
    action = mean + std * eps

    log_sqrt_2pi = 0.5 * math.log(2.0 * math.pi)

    # log_prob (sampling branch): (action - mean) == std * eps, so
    #   sum_j lp_j = -0.5 * sum_j eps_j^2 - sum_j logstd_j - A * log(sqrt(2*pi))
    lp_const = jnp.sum(logstd) + action_dim * log_sqrt_2pi            # scalar
    lp = -0.5 * jnp.sum(eps * eps, axis=1, keepdims=True) - lp_const  # (tile_b, 1)

    # entropy is independent of the batch: a single scalar
    ent = action_dim * (0.5 + log_sqrt_2pi) + jnp.sum(logstd)         # scalar

    # pack [action | log_prob | entropy] into one (tile_b, a_out) store
    lane = jax.lax.broadcasted_iota(jnp.int32, mean.shape, 1)
    packed = jnp.where(lane == action_dim, lp, action)
    packed = jnp.where(lane == action_dim + 1, ent, packed)
    out_ref[...] = packed


def actor_forward(obs, params, eps, action_dim, *, tile_b=4096):
    """Fused Actor forward.

    obs: (B, obs_dim) f32; eps: (B, action_dim) f32 standard-normal noise.
    params: lane-padded weights from init_actor_params.
    Returns (action (B, A), log_prob (B,), entropy (B,)).
    """
    B, obs_dim = obs.shape
    hidden = params["w0"].shape[1]
    a_out = params["wo"].shape[1]
    assert eps.shape == (B, action_dim)

    # cap tile_b at ~B/2 (keeps grid >= 2 for v7x megacore), keep it a multiple of 8
    half = max(1, (B + 1) // 2)
    tile_b = max(8, _round_up(min(tile_b, half), 8))
    grid = (pl.cdiv(B, tile_b),)

    # only remaining wrapper pad: tiny lane pad of eps to a_out (e.g. 4 -> 8),
    # zeros so log_prob sums stay exact
    if eps.shape[1] != a_out:
        eps = jnp.pad(eps, ((0, 0), (0, a_out - eps.shape[1])))

    def batch_spec(d):
        return pl.BlockSpec((tile_b, d), lambda i: (i, 0))

    def const_spec(r, c):
        return pl.BlockSpec((r, c), lambda i: (0, 0))

    flops = 2 * B * (obs_dim * hidden + hidden * hidden + hidden * a_out)
    bytes_accessed = 4 * (B * (obs_dim + 2 * a_out)
                          + obs_dim * hidden + hidden * hidden + hidden * a_out
                          + 2 * hidden + 2 * a_out)
    cost = pl.CostEstimate(flops=flops,
                           transcendentals=2 * B * hidden,
                           bytes_accessed=bytes_accessed)

    out = pl.pallas_call(
        functools.partial(actor_kernel, action_dim=action_dim),
        out_shape=jax.ShapeDtypeStruct((B, a_out), jnp.float32),
        grid=grid,
        in_specs=[
            batch_spec(obs_dim),          # obs (tiled over batch)
            const_spec(obs_dim, hidden),  # w0 (resident)
            const_spec(1, hidden),        # b0
            const_spec(hidden, hidden),   # w1
            const_spec(1, hidden),        # b1
            const_spec(hidden, a_out),    # wo
            const_spec(1, a_out),         # bo
            const_spec(1, a_out),         # logstd
            batch_spec(a_out),            # eps (tiled over batch)
        ],
        out_specs=batch_spec(a_out),
        compiler_params=pltpu.CompilerParams(
            dimension_semantics=("parallel",)),
        cost_estimate=cost,
    )(obs, params["w0"], params["b0"], params["w1"], params["b1"],
      params["wo"], params["bo"], params["logstd"], eps)

    action = out[:, :action_dim]
    log_prob = out[:, action_dim]
    entropy = out[:, action_dim + 1]
    return action, log_prob, entropy


def init_actor_params(key, obs_dim, action_dim, hidden_dim=64):
    """Deterministic synthetic init (scaled-gaussian stand-in for orthogonal
    init_layer). Hidden stays at its natural width; only the action side is
    zero-padded to a_out = round_up(action_dim + 2, 8) lanes (the +2 lanes are
    reused for log_prob / entropy), so the padded network is numerically
    identical to the unpadded one.
    """
    a_out = _round_up(action_dim + 2, 8)
    k0, k1, k2 = jax.random.split(key, 3)
    w0 = (jax.random.normal(k0, (obs_dim, hidden_dim), jnp.float32)
          * (math.sqrt(2.0) / math.sqrt(obs_dim)))
    w1 = (jax.random.normal(k1, (hidden_dim, hidden_dim), jnp.float32)
          * (math.sqrt(2.0) / math.sqrt(hidden_dim)))
    wo = jnp.zeros((hidden_dim, a_out), jnp.float32).at[:, :action_dim].set(
        jax.random.normal(k2, (hidden_dim, action_dim), jnp.float32) * 0.01)
    logstd = jnp.zeros((1, a_out), jnp.float32).at[:, :action_dim].set(
        math.log(0.5))
    return {
        "w0": w0, "b0": jnp.zeros((1, hidden_dim), jnp.float32),
        "w1": w1, "b1": jnp.zeros((1, hidden_dim), jnp.float32),
        "wo": wo, "bo": jnp.zeros((1, a_out), jnp.float32),
        "logstd": logstd,
    }


if __name__ == "__main__":
    key = jax.random.PRNGKey(0)
    k_param, k_obs, k_eps = jax.random.split(key, 3)

    batch, obs_dim, action_dim, hidden_dim = 80, 8, 4, 64

    params = init_actor_params(k_param, obs_dim, action_dim, hidden_dim)
    obs = jax.random.normal(k_obs, (batch, obs_dim), jnp.float32)
    eps = jax.random.normal(k_eps, (batch, action_dim), jnp.float32)

    # small tile_b so the demo exercises the batch grid (grid=3) and a partial
    # tail block (80 = 32 + 32 + 16, masked output stores on the tail)
    action, log_prob, entropy = actor_forward(obs, params, eps, action_dim,
                                              tile_b=32)
    jax.block_until_ready((action, log_prob, entropy))

    assert action.shape == (batch, action_dim)
    assert log_prob.shape == (batch,)
    assert entropy.shape == (batch,)

    # pure-JAX reference (padded params; zero padding is exact)
    x = jnp.tanh(obs @ params["w0"] + params["b0"])
    x = jnp.tanh(x @ params["w1"] + params["b1"])
    mean_ref = (x @ params["wo"] + params["bo"])[:, :action_dim]
    logstd_r = params["logstd"][:, :action_dim]
    std_ref = jnp.exp(logstd_r)
    action_ref = mean_ref + std_ref * eps
    log_sqrt_2pi = 0.5 * math.log(2.0 * math.pi)
    lp_ref = jnp.sum(-0.5 * eps ** 2 - logstd_r - log_sqrt_2pi, axis=1)
    ent_ref = jnp.sum(0.5 + log_sqrt_2pi + logstd_r)

    assert float(jnp.max(jnp.abs(action - action_ref))) < 1e-5
    assert float(jnp.max(jnp.abs(log_prob - lp_ref))) < 1e-4
    assert float(jnp.max(jnp.abs(entropy - ent_ref))) < 1e-4

    # sanity: entropy of N(mu, 0.5) summed over action dims is a known constant
    expected_ent = action_dim * (0.5 + 0.5 * math.log(2.0 * math.pi)
                                 + math.log(0.5))
    assert abs(float(entropy[0]) - expected_ent) < 1e-4

    print("KERNEL_OK")
</pallas_src>

<mosaic_0001>
module attributes {stable_mosaic.version = 11 : i64} {
  func.func @actor_kernel(%arg0: i32, %arg1: memref<32x8xf32, #tpu.memory_space<vmem>>, %arg2: memref<8x64xf32, #tpu.memory_space<vmem>>, %arg3: memref<1x64xf32, #tpu.memory_space<vmem>>, %arg4: memref<64x64xf32, #tpu.memory_space<vmem>>, %arg5: memref<1x64xf32, #tpu.memory_space<vmem>>, %arg6: memref<64x8xf32, #tpu.memory_space<vmem>>, %arg7: memref<1x8xf32, #tpu.memory_space<vmem>>, %arg8: memref<1x8xf32, #tpu.memory_space<vmem>>, %arg9: memref<32x8xf32, #tpu.memory_space<vmem>>, %arg10: memref<32x8xf32, #tpu.memory_space<vmem>>) attributes {dimension_semantics = [#tpu.dimension_semantics<parallel>], iteration_bounds = array<i64: 3>, scalar_prefetch = 0 : i64, scratch_operands = 0 : i64, tpu.core_type = #tpu.core_type<tc>, window_params = [{transform_indices = @transform_0, window_bounds = array<i64: 32, 8>}, {pipeline_mode = #tpu.pipeline_mode<synchronous>, transform_indices = @transform_1, window_bounds = array<i64: 8, 64>}, {pipeline_mode = #tpu.pipeline_mode<synchronous>, transform_indices = @transform_2, window_bounds = array<i64: 1, 64>}, {pipeline_mode = #tpu.pipeline_mode<synchronous>, transform_indices = @transform_3, window_bounds = array<i64: 64, 64>}, {pipeline_mode = #tpu.pipeline_mode<synchronous>, transform_indices = @transform_4, window_bounds = array<i64: 1, 64>}, {pipeline_mode = #tpu.pipeline_mode<synchronous>, transform_indices = @transform_5, window_bounds = array<i64: 64, 8>}, {pipeline_mode = #tpu.pipeline_mode<synchronous>, transform_indices = @transform_6, window_bounds = array<i64: 1, 8>}, {pipeline_mode = #tpu.pipeline_mode<synchronous>, transform_indices = @transform_7, window_bounds = array<i64: 1, 8>}, {transform_indices = @transform_8, window_bounds = array<i64: 32, 8>}, {transform_indices = @transform_9, window_bounds = array<i64: 32, 8>}]} {
    %c0 = arith.constant 0 : index
    %c0_0 = arith.constant 0 : index
    %0 = vector.load %arg1[%c0, %c0_0] : memref<32x8xf32, #tpu.memory_space<vmem>>, vector<32x8xf32>
    %c0_1 = arith.constant 0 : index
    %c0_2 = arith.constant 0 : index
    %1 = vector.load %arg2[%c0_1, %c0_2] : memref<8x64xf32, #tpu.memory_space<vmem>>, vector<8x64xf32>
    %cst = arith.constant dense<0.000000e+00> : vector<32x64xf32>
    %2 = tpu.matmul %0, %1, %cst {dimension_numbers = #tpu.dot_dimension_numbers<[1], [0], [0], [1], [0, 0, 1, 1], [], []>} : vector<32x8xf32>, vector<8x64xf32>, vector<32x64xf32> -> vector<32x64xf32>
    %c0_3 = arith.constant 0 : index
    %c0_4 = arith.constant 0 : index
    %3 = vector.load %arg3[%c0_3, %c0_4] : memref<1x64xf32, #tpu.memory_space<vmem>>, vector<1x64xf32>
    %4 = vector.broadcast %3 : vector<1x64xf32> to vector<32x64xf32>
    %5 = arith.addf %2, %4 : vector<32x64xf32>
    %6 = math.tanh %5 : vector<32x64xf32>
    %c0_5 = arith.constant 0 : index
    %c0_6 = arith.constant 0 : index
    %7 = vector.load %arg4[%c0_5, %c0_6] : memref<64x64xf32, #tpu.memory_space<vmem>>, vector<64x64xf32>
    %cst_7 = arith.constant dense<0.000000e+00> : vector<32x64xf32>
    %8 = tpu.matmul %6, %7, %cst_7 {dimension_numbers = #tpu.dot_dimension_numbers<[1], [0], [0], [1], [0, 0, 1, 1], [], []>} : vector<32x64xf32>, vector<64x64xf32>, vector<32x64xf32> -> vector<32x64xf32>
    %c0_8 = arith.constant 0 : index
    %c0_9 = arith.constant 0 : index
    %9 = vector.load %arg5[%c0_8, %c0_9] : memref<1x64xf32, #tpu.memory_space<vmem>>, vector<1x64xf32>
    %10 = vector.broadcast %9 : vector<1x64xf32> to vector<32x64xf32>
    %11 = arith.addf %8, %10 : vector<32x64xf32>
    %12 = math.tanh %11 : vector<32x64xf32>
    %c0_10 = arith.constant 0 : index
    %c0_11 = arith.constant 0 : index
    %13 = vector.load %arg6[%c0_10, %c0_11] : memref<64x8xf32, #tpu.memory_space<vmem>>, vector<64x8xf32>
    %cst_12 = arith.constant dense<0.000000e+00> : vector<32x8xf32>
    %14 = tpu.matmul %12, %13, %cst_12 {dimension_numbers = #tpu.dot_dimension_numbers<[1], [0], [0], [1], [0, 0, 1, 1], [], []>} : vector<32x64xf32>, vector<64x8xf32>, vector<32x8xf32> -> vector<32x8xf32>
    %c0_13 = arith.constant 0 : index
    %c0_14 = arith.constant 0 : index
    %15 = vector.load %arg7[%c0_13, %c0_14] : memref<1x8xf32, #tpu.memory_space<vmem>>, vector<1x8xf32>
    %16 = vector.broadcast %15 : vector<1x8xf32> to vector<32x8xf32>
    %17 = arith.addf %14, %16 : vector<32x8xf32>
    %c0_15 = arith.constant 0 : index
    %c0_16 = arith.constant 0 : index
    %18 = vector.load %arg8[%c0_15, %c0_16] : memref<1x8xf32, #tpu.memory_space<vmem>>, vector<1x8xf32>
    %19 = math.exp %18 : vector<1x8xf32>
    %c0_17 = arith.constant 0 : index
    %c0_18 = arith.constant 0 : index
    %20 = vector.load %arg9[%c0_17, %c0_18] : memref<32x8xf32, #tpu.memory_space<vmem>>, vector<32x8xf32>
    %21 = vector.broadcast %19 : vector<1x8xf32> to vector<32x8xf32>
    %22 = arith.mulf %21, %20 : vector<32x8xf32>
    %23 = arith.addf %17, %22 : vector<32x8xf32>
    %24 = vector.shape_cast %18 : vector<1x8xf32> to vector<1x1x8xf32>
    %cst_19 = arith.constant dense<0.000000e+00> : vector<1xf32>
    %25 = vector.multi_reduction <add>, %24, %cst_19 [1, 2] : vector<1x1x8xf32> to vector<1xf32>
    %26 = vector.shape_cast %25 : vector<1xf32> to vector<1x1x1xf32>
    %27 = vector.extract %26[0, 0, 0] : f32 from vector<1x1x1xf32>
    %cst_20 = arith.constant 3.67575407 : f32
    %28 = arith.addf %27, %cst_20 : f32
    %29 = arith.mulf %20, %20 : vector<32x8xf32>
    %cst_21 = arith.constant dense<0.000000e+00> : vector<32xf32>
    %30 = vector.multi_reduction <add>, %29, %cst_21 [1] : vector<32x8xf32> to vector<32xf32>
    %31 = vector.shape_cast %30 : vector<32xf32> to vector<32x1xf32>
    %cst_22 = arith.constant -5.000000e-01 : f32
    %32 = vector.broadcast %cst_22 : f32 to vector<32x1xf32>
    %33 = arith.mulf %32, %31 : vector<32x1xf32>
    %34 = vector.broadcast %28 : f32 to vector<32x1xf32>
    %35 = arith.subf %33, %34 : vector<32x1xf32>
    %36 = vector.shape_cast %18 : vector<1x8xf32> to vector<1x1x8xf32>
    %cst_23 = arith.constant dense<0.000000e+00> : vector<1xf32>
    %37 = vector.multi_reduction <add>, %36, %cst_23 [1, 2] : vector<1x1x8xf32> to vector<1xf32>
    %38 = vector.shape_cast %37 : vector<1xf32> to vector<1x1x1xf32>
    %39 = vector.extract %38[0, 0, 0] : f32 from vector<1x1x1xf32>
    %cst_24 = arith.constant 5.67575407 : f32
    %40 = arith.addf %cst_24, %39 : f32
    %41 = tpu.iota {dimensions = array<i32: 1>} : vector<32x8xi32>
    %c4_i32 = arith.constant 4 : i32
    %42 = vector.broadcast %c4_i32 : i32 to vector<32x8xi32>
    %43 = arith.cmpi eq, %41, %42 : vector<32x8xi32>
    %44 = vector.shape_cast %35 : vector<32x1xf32> to vector<32x1xf32>
    %45 = vector.broadcast %44 : vector<32x1xf32> to vector<32x8xf32>
    %46 = arith.select %43, %45, %23 : vector<32x8xi1>, vector<32x8xf32>
    %c5_i32 = arith.constant 5 : i32
    %47 = vector.broadcast %c5_i32 : i32 to vector<32x8xi32>
    %48 = arith.cmpi eq, %41, %47 : vector<32x8xi32>
    %49 = vector.broadcast %40 : f32 to vector<32x8xf32>
    %50 = arith.select %48, %49, %46 : vector<32x8xi1>, vector<32x8xf32>
    %c0_25 = arith.constant 0 : index
    %c0_26 = arith.constant 0 : index
    %51 = vector.load %arg10[%c0_25, %c0_26] : memref<32x8xf32, #tpu.memory_space<vmem>>, vector<32x8xf32>
    tpu.vector_store %arg10[%c0_25, %c0_26], %50 {strides = array<i32>} : memref<32x8xf32, #tpu.memory_space<vmem>>, vector<32x8xf32>,
    return
  }
  func.func @transform_0(%arg0: i32) -> (i32, i32) {
    %c0_i32 = arith.constant 0 : i32
    %c0_i32_0 = arith.constant 0 : i32
    return %arg0, %c0_i32 : i32, i32
  }
  func.func @transform_1(%arg0: i32) -> (i32, i32) {
    %c0_i32 = arith.constant 0 : i32
    %c0_i32_0 = arith.constant 0 : i32
    %c0_i32_1 = arith.constant 0 : i32
    return %c0_i32, %c0_i32_0 : i32, i32
  }
  func.func @transform_2(%arg0: i32) -> (i32, i32) {
    %c0_i32 = arith.constant 0 : i32
    %c0_i32_0 = arith.constant 0 : i32
    %c0_i32_1 = arith.constant 0 : i32
    return %c0_i32, %c0_i32_0 : i32, i32
  }
  func.func @transform_3(%arg0: i32) -> (i32, i32) {
    %c0_i32 = arith.constant 0 : i32
    %c0_i32_0 = arith.constant 0 : i32
    %c0_i32_1 = arith.constant 0 : i32
    return %c0_i32, %c0_i32_0 : i32, i32
  }
  func.func @transform_4(%arg0: i32) -> (i32, i32) {
    %c0_i32 = arith.constant 0 : i32
    %c0_i32_0 = arith.constant 0 : i32
    %c0_i32_1 = arith.constant 0 : i32
    return %c0_i32, %c0_i32_0 : i32, i32
  }
  func.func @transform_5(%arg0: i32) -> (i32, i32) {
    %c0_i32 = arith.constant 0 : i32
    %c0_i32_0 = arith.constant 0 : i32
    %c0_i32_1 = arith.constant 0 : i32
    return %c0_i32, %c0_i32_0 : i32, i32
  }
  func.func @transform_6(%arg0: i32) -> (i32, i32) {
    %c0_i32 = arith.constant 0 : i32
    %c0_i32_0 = arith.constant 0 : i32
    %c0_i32_1 = arith.constant 0 : i32
    return %c0_i32, %c0_i32_0 : i32, i32
  }
  func.func @transform_7(%arg0: i32) -> (i32, i32) {
    %c0_i32 = arith.constant 0 : i32
    %c0_i32_0 = arith.constant 0 : i32
    %c0_i32_1 = arith.constant 0 : i32
    return %c0_i32, %c0_i32_0 : i32, i32
  }
  func.func @transform_8(%arg0: i32) -> (i32, i32) {
    %c0_i32 = arith.constant 0 : i32
    %c0_i32_0 = arith.constant 0 : i32
    return %arg0, %c0_i32 : i32, i32
  }
  func.func @transform_9(%arg0: i32) -> (i32, i32) {
    %c0_i32 = arith.constant 0 : i32
    %c0_i32_0 = arith.constant 0 : i32
    return %arg0, %c0_i32 : i32, i32
  }
}

</mosaic_0001>

<bundles_post_ra>
// kernel: tpu_custom_call.1
= control target key start
LH: loop header
LB: loop body
LE: loop exit
PB: predicated region body
PF: predicated region fallthrough
CT: control target
= control target key end

     0   :  { %s1457_s30 = smov 0   ;;  %s1459_s10 = smov 0   ;;  %s1677_s0 = inlined_call_operand.vmem [shape: f32[80,8], index: 0, kind: input, shape index: {}]   ;;  %s1678_s1 = inlined_call_operand.vmem [shape: f32[8,64], index: 1, kind: input, shape index: {}]   ;;  %s1679_s2 = inlined_call_operand.vmem [shape: f32[1,64], index: 2, kind: input, shape index: {}]   ;;  %s1680_s3 = inlined_call_operand.vmem [shape: f32[64,64], index: 3, kind: input, shape index: {}]   ;;  %s1681_s4 = inlined_call_operand.vmem [shape: f32[1,64], index: 4, kind: input, shape index: {}]   ;;  %s1682_s5 = inlined_call_operand.vmem [shape: f32[64,8], index: 5, kind: input, shape index: {}]   ;;  %s1683_s6 = inlined_call_operand.vmem [shape: f32[1,8], index: 6, kind: input, shape index: {}]   ;;  %s1684_s7 = inlined_call_operand.vmem [shape: f32[1,8], index: 7, kind: input, shape index: {}]   ;;  %s1685_s8 = inlined_call_operand.vmem [shape: f32[80,8], index: 8, kind: input, shape index: {}]   ;;  %s1686_s9 = inlined_call_operand.vmem [shape: f32[80,8], index: 9, kind: output, shape index: {}]  }
   0x1   :  { %s1461_s11 = smov 0  }
   0x2 LB: > { %s1470_s12 = sadd.s32 4294967295, %s1373_s11   ;;  %s1472_s13 = sadd.s32 1, %s1373_s11   ;;  %s1373_s11 = sphi %s1461_s11, %s1693_s11   ;;  %s1369_s10 = sphi %s1459_s10, %s1692_s10   ;;  %s1365_s30 = sphi %s1457_s30, %s1691_s30  }
   0x3   : > { %s222_s14 = ssub.s32 %s1373_s11, %s1472_s13  ;;  %s225_s15 = sadd.s32 1, %s1369_s10 }
   0x4   : > { %p223_p0 = scmp.eq.s32.totalorder %s222_s14, 0  ;;  %p235_p1 = scmp.ne.s32.totalorder %s1369_s10, %s1365_s30 }
   0x5   : > { %p236_p2 = scmp.eq.s32.totalorder %s1470_s12, 2  ;;  %p1057_p3 = scmp.ge.s32.totalorder %s1373_s11, 1 }
   0x6   : > { %s1480_s16 = scalar_select %p223_p0, %s1369_s10, %s225_s15  }
   0x7   : > { %p1482_p4 = por %p236_p2, %p235_p1  ;;  %p315_p5 = scmp.lt.s32.totalorder %s1373_s11, 4 }
   0x9   : > { %p316_p6 = pnand %p1057_p3, %p315_p5 }
   0xa   : > { %v400_v0 = vld [vmem:[%s1678_s1] sm:$0xff] (!%p316_p6)  ;;  %s1490_s20 = sshll.u32 (!%p316_p6), %s1470_s12, 2  ;;  %vm408_vm0 = vcmask (!%p316_p6), 64512   ;;  %v511_v6 = vld [vmem:[%s1680_s3 + $0x8] sm:$0xff] (!%p316_p6)  ;;  %v512_v8 = vld [vmem:[%s1680_s3 + $0x10] sm:$0xff] (!%p316_p6)  ;;  %vm525_vm1 = vcmask (!%p316_p6), 523264   ;;  %v747_v51 = vlaneseq (!%p316_p6) }
   0xb   : > { %319 = sbr.rel (%p316_p6) target bundleno = 751 (0x2ef), region = 56  ;;  %1127 = vmatprep.subr.mxu0 (!%p316_p6), %v400_v0  ;;  %p368_p7 = scmp.lt.s32.totalorder (!%p316_p6), %s1490_s20, 9  ;;  %v510_v5 = vld [vmem:[%s1680_s3] sm:$0xff] (!%p316_p6)  ;;  %v513_v9 = vld [vmem:[%s1680_s3 + $0x18] sm:$0xff] (!%p316_p6)  ;;  %v515_v12 = vld [vmem:[%s1680_s3 + $0x28] sm:$0xff] (!%p316_p6)  ;;  %vm760_vm2 = vcmask (!%p316_p6), 57344  }
   0xc   : > { %1128 = vmatpush3.msra.mxu0 (!%p316_p6), %v400_v0  ;;  %v1179_v7 = vpack.c.bf16 (!%p316_p6), %v511_v6, %v510_v5  ;;  %v1183_v10 = vpack.c.bf16 (!%p316_p6), %v513_v9, %v512_v8  ;;  %v514_v11 = vld [vmem:[%s1680_s3 + $0x20] sm:$0xff] (!%p316_p6)  ;;  %v516_v14 = vld [vmem:[%s1680_s3 + $0x30] sm:$0xff] (!%p316_p6)  ;;  %v517_v15 = vld [vmem:[%s1680_s3 + $0x38] sm:$0xff] (!%p316_p6)  ;;  %v748_v57 = vshrl.u32 (!%p316_p6), %v747_v51, 7  ;;  %s360_s14 = sand.u32 (!%p316_p6), 1, %s1365_s30  }
   0xd   : > { %v1187_v13 = vpack.c.bf16 (!%p316_p6), %v515_v12, %v514_v11  ;;  %v1191_v16 = vpack.c.bf16 (!%p316_p6), %v517_v15, %v516_v14  ;;  %v1063_v17 = vld [vmem:[%s1679_s2] ss:$0 sm:$0xff] (!%p316_p6)  ;;  %v628_v31 = vld [vmem:[%s1682_s5 + $0x8] sm:$0xff] (!%p316_p6)  ;;  %v629_v33 = vld [vmem:[%s1682_s5 + $0x10] sm:$0xff] (!%p316_p6)  ;;  %s1058_s23 = sshll.u32 (!%p316_p6), %s360_s14, 5 }
   0xe   : > { %1180 = vmatprep.subr.bf16.mxu1 (!%p316_p6), %v1179_v7  ;;  %v627_v30 = vld [vmem:[%s1682_s5] sm:$0xff] (!%p316_p6)  ;;  %v630_v34 = vld [vmem:[%s1682_s5 + $0x18] sm:$0xff] (!%p316_p6)  ;;  %v632_v37 = vld [vmem:[%s1682_s5 + $0x28] sm:$0xff] (!%p316_p6)  ;;  %v749_v59 = vsub.s32 (!%p316_p6), 0, %v748_v57  ;;  %s1606_s30 = scalar_lea.vmem (!%p316_p6), [#allocation2], %s1058_s23  }
   0xf   : > { %1182 = vmatpush3.bf16.msra.mxu1 (!%p316_p6), %v1179_v7  ;;  %v1195_v32 = vpack.c.bf16 (!%p316_p6), %v628_v31, %v627_v30  ;;  %v1199_v35 = vpack.c.bf16 (!%p316_p6), %v630_v34, %v629_v33  ;;  %v631_v36 = vld [vmem:[%s1682_s5 + $0x20] sm:$0xff] (!%p316_p6)  ;;  %v633_v39 = vld [vmem:[%s1682_s5 + $0x30] sm:$0xff] (!%p316_p6)  ;;  %v634_v40 = vld [vmem:[%s1682_s5 + $0x38] sm:$0xff] (!%p316_p6) }
  0x10   : > { %1184 = vmatprep.subr.bf16.mxu1 (!%p316_p6), %v1183_v10  ;;  %v1203_v38 = vpack.c.bf16 (!%p316_p6), %v632_v37, %v631_v36  ;;  %v1207_v41 = vpack.c.bf16 (!%p316_p6), %v634_v40, %v633_v39  ;;  %v739_v42 = vld [vmem:[%s1684_s7] sm:$0x1] (!%p316_p6) }
  0x11   : > { %1196 = vmatprep.subr.bf16.mxu0 (!%p316_p6), %v1195_v32  ;;  %v761_v45 = vsel (!%p316_p6), %vm760_vm2, %v739_v42, 0.0  ;;  %v740_v46 = vmul.f32 (!%p316_p6), 1.442695, %v739_v42  ;;  %v1068_v63 = vld [vmem:[%s1681_s4] ss:$0 sm:$0xff] (!%p316_p6) }
  0x12   : > { %s1494_s21 = scalar_select %p368_p7, %s1490_s20, 9  ;;  %762 = vadd.xlane.f32.xlu0 %v761_v45 }
  0x13   : > { %1186 = vmatpush3.bf16.msra.mxu1 %v1183_v10  ;;  %s823_s24 = ssub.s32 (%p1482_p4), 10, %s1490_s20 }
  0x14   : > { %s1060_s22 = sshll.u32 %s1494_s21, 3  ;;  %1188 = vmatprep.subr.bf16.mxu1 %v1187_v13  ;;  %p824_p8 = scmp.lt.s32.totalorder (%p1482_p4), %s823_s24, 4 }
  0x15   : > { %s371_s25 = scalar_lea.vmem %s1677_s0, %s1060_s22  ;;  %s385_s26 = scalar_lea.vmem %s1685_s8, %s1060_s22 }
  0x16   : > { %v396_v1 = vld [vmem:[%s371_s25] sm:$0xff]  ;;  %v397_v2 = vld [vmem:[%s371_s25 + $0x8] sm:$0xff]  ;;  %v398_v3 = vld [vmem:[%s371_s25 + $0x10] sm:$0xff] }
  0x17   : > { %1129 = vmatprep.mubr.msk.f32.mxu0 %vm408_vm0, %v396_v1  ;;  %v399_v4 = vld [vmem:[%s371_s25 + $0x18] sm:$0xff]  ;;  %1190 = vmatpush3.bf16.msra.mxu1 %v1187_v13  ;;  %v743_v43 = vld [vmem:[%s385_s26 + $0x8] sm:$0xff]  ;;  %v1569_v44 = vld [vmem:[%s385_s26] sm:$0xff]  ;;  %s1095_s25 = sshll.u32 (%p1482_p4), %s1470_s12, 5 }
  0x18   : > { %1130 = vmatmul.mubr.msk.f32.vlgmr.msra.gmra.mrb[0].mxu0 %vm408_vm0, %v397_v2  ;;  %1192 = vmatprep.subr.bf16.mxu1 %v1191_v16  ;;  %v773_v47 = vmul.f32 %v743_v43, %v743_v43  ;;  %v772_v48 = vmul.f32 %v1569_v44, %v1569_v44  ;;  %v1573_v49 = vld [vmem:[%s385_s26 + $0x10] sm:$0xff]  ;;  %v1575_v50 = vld [vmem:[%s385_s26 + $0x18] sm:$0xff]  ;;  %s1628_s28 = scalar_lea.vmem (%p1482_p4), %s1686_s9, %s1095_s25  }
  0x19   : > { %1132 = vmatprep.mubr.msk.f32.mxu0 %vm408_vm0, %v398_v3  ;;  %1198 = vmatpush3.bf16.msra.mxu0 %v1195_v32  ;;  %v774_v52 = vmul.f32 %v1573_v49, %v1573_v49  ;;  %v775_v55 = vmul.f32 %v1575_v50, %v1575_v50 }
  0x1a   : > { %1200 = vmatprep.subr.bf16.mxu0 %v1199_v35  ;;  %v779_v53 = vsel %vm408_vm0, %v773_v47, 0.0  ;;  %v776_v54 = vsel %vm408_vm0, %v772_v48, 0.0 }
  0x1b   : > { %1194 = vmatpush3.bf16.msra.mxu1 %v1191_v16  ;;  %780 = vadd.xlane.f32.xlu1 %v779_v53  ;;  %v782_v56 = vsel %vm408_vm0, %v774_v52, 0.0  ;;  %v785_v58 = vsel %vm408_vm0, %v775_v55, 0.0 }
  0x1c   : > { %1133 = vmatmul.mubr.msk.f32.gmra.mrb[2].mxu0 %vm408_vm0, %v399_v4  ;;  %777 = vadd.xlane.f32.xlu0 %v776_v54 }
  0x1d   : > { %1202 = vmatpush3.bf16.msra.mxu0 %v1199_v35 }
  0x1e   : > { %1204 = vmatprep.subr.bf16.mxu0 %v1203_v38 }
  0x1f   : > { %783 = vadd.xlane.f32.xlu1 %v782_v56 }
  0x20   : > { %786 = vadd.xlane.f32.xlu0 %v785_v58 }
  0x21   : > { %1206 = vmatpush3.bf16.msra.mxu0 %v1203_v38 }
  0x22   : > { %1208 = vmatprep.subr.bf16.mxu0 %v1207_v41 }
  0x25   : > { %1210 = vmatpush3.bf16.msra.mxu0 %v1207_v41 }
  0x9f   : > { %v763_v12 = vpop.xlane.xlu0 %762 }
  0xa0   : > { %v764_v13 = vrot.slane %v763_v12, 4 }
  0xa2   : > { %v765_v14 = vadd.f32 %v764_v13, %v763_v12 }
  0xa4   : > { %v766_v15 = vrot.slane %v765_v14, 2 }
  0xa6   : > { %v767_v16 = vadd.f32 %v766_v15, %v765_v14 }
  0xeb   : > { %v1131_v18 = vpop.f32.mrb[0].mxu0 }
  0xec   : > { %v493_v19 = vadd.f32 %v1131_v18, %v1063_v17  ;;  %v487_v20 = vpop.f32.mrb[1].mxu0 }
  0xed   : > { %v488_v21 = vadd.f32 %v1063_v17, %v487_v20  ;;  %v781_v20 = vpop.xlane.xlu1 %780 }
  0xef   : > { %1301 = vtanh.f32 %v488_v21  ;;  %v1134_v22 = vpop.f32.mrb[2].mxu0  ;;  %v789_v21 = vmul.f32 -0.5, %v781_v20 }
  0xf0   : > { %1303 = vtanh.f32 %v493_v19  ;;  %v503_v23 = vadd.f32 %v1134_v22, %v1063_v17  ;;  %v497_v24 = vpop.f32.mrb[3].mxu0  ;;  %v778_v19 = vpop.xlane.xlu0 %777 }
  0xf1   : > { %v498_v25 = vadd.f32 %v1063_v17, %v497_v24  ;;  %v768_v17 = vrot.slane %v767_v16, 1  ;;  %v799_v24 = vand.u32 127, %v747_v51  ;;  %v784_v30 = vpop.xlane.xlu1 %783 }
  0xf2   : > { %v790_v38 = vmul.f32 -0.5, %v784_v30 }
  0xf3   : > { %1305 = vtanh.f32 %v498_v25  ;;  %v769_v18 = vadd.f32 %v768_v17, %v767_v16  ;;  %v788_v25 = vmul.f32 -0.5, %v778_v19  ;;  %vm800_vm3 = vcmp.eq.s32.totalorder %v799_v24, 4 }
  0xf4   : > { %1307 = vtanh.f32 %v503_v23  ;;  %v1073_v23 = vld [vmem:[%s1683_s6] ss:$0 sm:$0xff]  ;;  %vm805_vm4 = vcmp.eq.s32.totalorder %v799_v24, 5 }
  0xf5   : > { %1309 = vpow2.f32 %v740_v46  ;;  %1211 = vpush %v769_v18 }
  0xf9   : > { %v1302_v26 = vpop.eup %1301 }
  0xfa   : > { %v1304_v27 = vpop.eup %1303  ;;  %1151 = vmatprep.mubr.msk.f32.mxu1 %vm525_vm1, %v1302_v26  ;;  %v787_v26 = vpop.xlane.xlu0 %786 }
  0xfb   : > { %1152 = vmatmul.mubr.msk.f32.vlgmr.msra.gmra.mrb[0].mxu1 %vm525_vm1, %v1304_v27  ;;  %v791_v34 = vmul.f32 -0.5, %v787_v26 }
  0xfd   : > { %v1306_v28 = vpop.eup %1305 }
  0xfe   : > { %v1308_v29 = vpop.eup %1307  ;;  %1154 = vmatprep.mubr.msk.f32.mxu1 %vm525_vm1, %v1306_v28 }
  0xff   : > { %1155 = vmatmul.mubr.msk.f32.gmra.mrb[2].mxu1 %vm525_vm1, %v1308_v29  ;;  %v1310_v60 = vpop.eup %1309 }
 0x100   : > { %v750_v61 = vrot.slane %v1310_v60, %v749_v59 }
 0x102   : > { %v753_v62 = vmul.f32 %v750_v61, %v743_v43  ;;  %v752_v28 = vmul.f32 %v750_v61, %v1569_v44  ;;  %v755_v36 = vmul.f32 %v750_v61, %v1575_v50  ;;  %v754_v41 = vmul.f32 %v750_v61, %v1573_v49 }
 0x126   : > { %s1592_s29 = spop %1211 }
 0x127   : > { %s771_s11 = sadd.f32 3.675754, %s1592_s29 }
 0x128   : > { %s797_s19 = sadd.f32 5.675754, %s1592_s29 }
 0x129   : > { %v792_v22 = vstv %s771_s11 }
 0x12a   : > { %v794_v29 = vsub.f32 %v789_v21, %v792_v22  ;;  %v793_v37 = vsub.f32 %v788_v25, %v792_v22  ;;  %v806_v42 = vstv %s797_s19  ;;  %v796_v51 = vsub.f32 %v791_v34, %v792_v22 }
 0x12b   : > { %v795_v52 = vsub.f32 %v790_v38, %v792_v22 }
 0x1ce   : > { %v1153_v0 = vpop.f32.mrb[0].mxu1 }
 0x1cf   : > { %v610_v1 = vadd.f32 %v1153_v0, %v1068_v63  ;;  %v604_v2 = vpop.f32.mrb[1].mxu1 }
 0x1d0   : > { %v605_v3 = vadd.f32 %v1068_v63, %v604_v2 }
 0x1d2   : > { %1311 = vtanh.f32 %v605_v3  ;;  %v1156_v4 = vpop.f32.mrb[2].mxu1 }
 0x1d3   : > { %1313 = vtanh.f32 %v610_v1  ;;  %v620_v5 = vadd.f32 %v1156_v4, %v1068_v63  ;;  %v614_v6 = vpop.f32.mrb[3].mxu1 }
 0x1d4   : > { %v615_v7 = vadd.f32 %v1068_v63, %v614_v6 }
 0x1d6   : > { %1315 = vtanh.f32 %v615_v7 }
 0x1d7   : > { %1317 = vtanh.f32 %v620_v5 }
 0x1dc   : > { %v1312_v8 = vpop.eup %1311 }
 0x1dd   : > { %v1314_v9 = vpop.eup %1313  ;;  %1173 = vmatprep.mubr.msk.f32.mxu0 %vm525_vm1, %v1312_v8 }
 0x1de   : > { %1174 = vmatmul.mubr.msk.f32.vlgmr.msra.gmra.mrb[4].mxu0 %vm525_vm1, %v1314_v9 }
 0x1e0   : > { %v1316_v10 = vpop.eup %1315 }
 0x1e1   : > { %v1318_v11 = vpop.eup %1317  ;;  %1176 = vmatprep.mubr.msk.f32.mxu0 %vm525_vm1, %v1316_v10 }
 0x1e2   : > { %1177 = vmatmul.mubr.msk.f32.gmra.mrb[6].mxu0 %vm525_vm1, %v1318_v11 }
 0x2b1   : > { %v1175_v27 = vpop.f32.mrb[4].mxu0 }
 0x2b2   : > { %v726_v31 = vadd.f32 %v1175_v27, %v1073_v23  ;;  %v720_v32 = vpop.f32.mrb[5].mxu0 }
 0x2b3   : > { %v721_v33 = vadd.f32 %v1073_v23, %v720_v32 }
 0x2b4   : > { %v757_v35 = vadd.f32 %v753_v62, %v726_v31 }
 0x2b5   : > { %v756_v39 = vadd.f32 %v752_v28, %v721_v33  ;;  %v1178_v40 = vpop.f32.mrb[6].mxu0 }
 0x2b6   : > { %v802_v43 = vsel %vm800_vm3, %v794_v29, %v757_v35  ;;  %v736_v44 = vadd.f32 %v1178_v40, %v1073_v23  ;;  %v730_v45 = vpop.f32.mrb[7].mxu0 }
 0x2b7   : > { %v808_v46 = vsel %vm805_vm4, %v806_v42, %v802_v43  ;;  %v801_v47 = vsel %vm800_vm3, %v793_v37, %v756_v39  ;;  %v731_v48 = vadd.f32 %v1073_v23, %v730_v45  ;;  %821 = sbr.rel (!%p1482_p4) target bundleno = 751 (0x2ef), region = 60 }
 0x2b8   : > { %812 = vst.msk [vmem:[%s1606_s30 + $0x8] sm:$0xff] %vm408_vm0, %v808_v46  ;;  %v807_v49 = vsel %vm805_vm4, %v806_v42, %v801_v47  ;;  %v759_v50 = vadd.f32 %v755_v36, %v736_v44 }
 0x2b9   : > { %811 = vst.msk [vmem:[%s1606_s30] sm:$0xff] %vm408_vm0, %v807_v49  ;;  %v758_v53 = vadd.f32 %v754_v41, %v731_v48 }
 0x2ba   : > { %v804_v54 = vsel %vm800_vm3, %v796_v51, %v759_v50 }
 0x2bb   : > { %v810_v55 = vsel %vm805_vm4, %v806_v42, %v804_v54  ;;  %v803_v56 = vsel %vm800_vm3, %v795_v52, %v758_v53 }
 0x2bc   : > { %814 = vst.msk [vmem:[%s1606_s30 + $0x18] sm:$0xff] %vm408_vm0, %v810_v55  ;;  %v809_v57 = vsel %vm805_vm4, %v806_v42, %v803_v56 }
 0x2bd   : > { %813 = vst.msk [vmem:[%s1606_s30 + $0x10] sm:$0xff] %vm408_vm0, %v809_v57 }
 0x2be   : > { %s1695_s24 = smov (!%p824_p8, %s823_s24), 4 }
 0x2bf   : > { %s1080_s21 = sshll.u32 %s1695_s24, 7 }
 0x2c0   : > { %p1083_p9 = scmp.eq.s32.totalorder %s1080_s21, 0 }
 0x2c1   : > { %s1634_s22 = sshrl.u32 (!%p1083_p9), %s1695_s24, 2 }
 0x2c2   : > { %832 = sbr.rel (%p1083_p9) target bundleno = 751 (0x2ef), region = 64  ;;  %p1084_p10 = scmp.le.s32.totalorder (!%p1083_p9), %s1634_s22, 0 }
 0x2c9   : > { %1004 = sbr.rel (%p1084_p10) target bundleno = 730 (0x2da), region = 143  ;;  %s1688_s12 = smov (!%p1084_p10), %s1628_s28 }
 0x2ca   : > { %s1689_s17 = smov (!%p1084_p10), %s1606_s30  ;;  %s1643_s20 = smov (!%p1084_p10), 0  }
 0x2cb   : > { %s1387_s29 = smov (!%p1084_p10), 0  }
 0x2d0 LB: >> { %v900_v58 = vld [vmem:[%s1381_s17] sm:$0xff]  ;;  %v902_v59 = vld [vmem:[%s1381_s17 + $0x8] sm:$0xff]  ;;  %v904_v60 = vld [vmem:[%s1381_s17 + $0x10] sm:$0xff]  ;;  %s908_s11 = sadd.s32 1, %s1385_s20  ;;  %s894_s29 = sadd.s32 1, %s1389_s29   ;;  %s1389_s29 = sphi %s1387_s29, %s894_s29   ;;  %s1385_s20 = sphi %s1643_s20, %s1690_s20   ;;  %s1381_s17 = sphi %s1689_s17, %s913_s17   ;;  %s1377_s12 = sphi %s1688_s12, %s914_s12  }
 0x2d1   : >> { %901 = vst [vmem:[%s1377_s12] sm:$0xff] %v900_v58  ;;  %903 = vst [vmem:[%s1377_s12 + $0x8] sm:$0xff] %v902_v59  ;;  %v906_v61 = vld [vmem:[%s1381_s17 + $0x18] sm:$0xff]  ;;  %p909_p11 = scmp.ge.s32.totalorder %s908_s11, %s1634_s22  ;;  %p893_p12 = scmp.ge.s32.totalorder %s894_s29, %s1634_s22 }
 0x2d2   : >> { %905 = vst [vmem:[%s1377_s12 + $0x10] sm:$0xff] %v904_v60  ;;  %907 = vst [vmem:[%s1377_s12 + $0x18] sm:$0xff] %v906_v61 }
 0x2d3   : >> { %s1697_s11 = smov (%p909_p11, %s908_s11), 0  ;;  %896 = sbr.rel (!%p893_p12) target bundleno = 720 (0x2d0), region = 149 }
 0x2d4   : >> { %s1085_s14 = sshll.u32 %s1697_s11, 5  ;;  %s1690_s20 = smov %s1697_s11 }
 0x2d5   : >> { %s913_s17 = scalar_lea.vmem %s1606_s30, %s1085_s14 [#allocation2]   ;;  %s914_s12 = scalar_lea.vmem %s1628_s28, %s1085_s14  }
 0x2da PF: > { %s1659_s15 = sand.u32 3, %s1695_s24   ;;  %s1096_s18 = sshll.u32 %s1634_s22, 5 }
 0x2db   : > { %s919_s19 = scalar_lea.vmem %s1606_s30, %s1096_s18 [#allocation2]   ;;  %s921_s23 = scalar_lea.vmem %s1628_s28, %s1096_s18  }
 0x2dc   : > { %p1090_p13 = scmp.le.s32.totalorder %s1659_s15, 0 }
 0x2dd   : > { %s1391_s25 = smov (!%p1090_p13), %s921_s23   ;;  %s1395_s26 = smov (!%p1090_p13), %s919_s19  }
 0x2de   : > { %1018 = sbr.rel (%p1090_p13) target bundleno = 751 (0x2ef), region = 154  ;;  %s1399_s27 = smov (!%p1090_p13), 0  }
 0x2df   : > { %s1403_s21 = smov (!%p1090_p13), 0  }
 0x2e5 LB: >> { %v931_v62 = vld [vmem:[%s1397_s26] sm:$0xff]  ;;  %s933_s24 = sadd.s32 1, %s1401_s27  ;;  %s925_s21 = sadd.s32 1, %s1405_s21   ;;  %s1405_s21 = sphi %s1403_s21, %s925_s21   ;;  %s1401_s27 = sphi %s1399_s27, %s1400_s27   ;;  %s1397_s26 = sphi %s1395_s26, %s938_s26   ;;  %s1393_s25 = sphi %s1391_s25, %s939_s25  }
 0x2e6   : >> { %932 = vst [vmem:[%s1393_s25] sm:$0xff] %v931_v62  ;;  %p934_p0 = scmp.ge.s32.totalorder %s933_s24, %s1659_s15  ;;  %p924_p1 = scmp.ge.s32.totalorder %s925_s21, %s1659_s15 }
 0x2e8   : >> { %s1699_s24 = smov (%p934_p0, %s933_s24), 0  ;;  %927 = sbr.rel (!%p924_p1) target bundleno = 741 (0x2e5), region = 160 }
 0x2e9   : >> { %s1091_s30 = sshll.u32 %s1699_s24, 3  ;;  %s1400_s27 = smov %s1699_s24  }
 0x2ea   : >> { %s938_s26 = scalar_lea.vmem %s919_s19, %s1091_s30 [#allocation2]   ;;  %s939_s25 = scalar_lea.vmem %s921_s23, %s1091_s30  }
 0x2ef PF: > { %p16_p2 = scmp.ge.s32.totalorder %s1472_s13, 5   ;;  %s1691_s30 = smov %s1369_s10 }
 0x2f0   : > { %s1692_s10 = smov %s1480_s16  ;;  %s1693_s11 = smov %s1472_s13 }
 0x2f1   :  { %18 = sbr.rel (!%p16_p2) target bundleno = 2 (0x2), region = 171 }

</bundles_post_ra>
